<compile_context>
chip_gen: v7x
topology: tpu7x:2x2x1
jax: 0.10.0
libtpu: 0.0.40
codegen_flags: <defaults>
</compile_context>

<pallas_src>
import jax
import jax.numpy as jnp
from jax import lax
from jax.experimental import pallas as pl
from jax.experimental.pallas import tpu as pltpu

_LANE = 128
_SUBLANE = 8


def _cdiv(a: int, b: int) -> int:
    return -(-a // b)


def _round_up(v: int, m: int) -> int:
    return _cdiv(v, m) * m


def _normalized_w(w_ref, out_dtype):
    # F.normalize(fc_bin, dim=1): L2-normalize each (part, out-column) over c_in.
    # rsqrt (EUP) + multiply instead of sqrt + divide; eps on the squared sum
    # (1e-24) reproduces max(||w||, 1e-12) exactly. Zero columns map to zero.
    w32 = w_ref[...].astype(jnp.float32)
    inv = lax.rsqrt(jnp.maximum(jnp.sum(w32 * w32, axis=1, keepdims=True), 1e-24))
    return (w32 * inv).astype(out_dtype)


def _kernel_plain(x_ref, w_ref, o_ref):
    o_ref[...] = jnp.einsum(
        "pnc,pco->pno", x_ref[...], w_ref[...],
        preferred_element_type=jnp.float32).astype(o_ref.dtype)


def _kernel_norm_inline(x_ref, w_ref, o_ref):
    w = _normalized_w(w_ref, w_ref.dtype)
    o_ref[...] = jnp.einsum(
        "pnc,pco->pno", x_ref[...], w,
        preferred_element_type=jnp.float32).astype(o_ref.dtype)


def _kernel_norm_cached(x_ref, w_ref, o_ref, wn_ref):
    # Weight-resident grid order (p, co, n): the weight block only changes when
    # the innermost n index resets to 0, so normalize once into VMEM scratch
    # and reuse it for every n-tile sharing this (p, co) weight block.
    @pl.when(pl.program_id(2) == 0)
    def _():
        wn_ref[...] = _normalized_w(w_ref, wn_ref.dtype)

    o_ref[...] = jnp.einsum(
        "pnc,pco->pno", x_ref[...], wn_ref[...],
        preferred_element_type=jnp.float32).astype(o_ref.dtype)


def separate_fcs(x: jax.Array, fc_bin: jax.Array, norm: bool = False,
                 *, vmem_budget_bytes: int | None = None) -> jax.Array:
    """x: [p, n, c_in], fc_bin: [p, c_in, c_out] -> [p, n, c_out]."""
    p, n, c_in = x.shape
    p_w, c_in_w, c_out = fc_bin.shape
    assert p == p_w and c_in == c_in_w
    out_dtype = x.dtype

    xb = jnp.dtype(x.dtype).itemsize
    wb = jnp.dtype(fc_bin.dtype).itemsize
    ob = jnp.dtype(out_dtype).itemsize

    # ---- generation-aware VMEM sizing (128 MiB v5e/v6e, 64 MiB per TC v7x).
    try:
        vmem_cap = int(pltpu.get_tpu_info().vmem_capacity_bytes)
    except Exception:
        vmem_cap = 64 * 1024 * 1024
    if vmem_budget_bytes is None:
        vmem_budget_bytes = vmem_cap // 2

    # ---- tile selection: full-extent blocks below the cap (always legal, no
    # padding needed); otherwise (8,128)-aligned tiles sized to minimize the
    # ragged tail (e.g. n=520 -> tile 264, not padded to 1024).
    def pick(dim, cap, align):
        if dim <= cap:
            return dim
        return _round_up(_cdiv(dim, _cdiv(dim, cap)), align)

    n_tile = pick(n, 512, _SUBLANE)
    co_tile = pick(c_out, 512, _LANE)
    p_tile = min(8, p)

    def est_vmem(pt, nt, ct):
        # On-chip layout pads second-to-last dims to 8 and last dims to 128.
        x_blk = pt * _round_up(nt, _SUBLANE) * _round_up(c_in, _LANE) * xb
        w_blk = pt * _round_up(c_in, _SUBLANE) * _round_up(ct, _LANE) * wb
        o_blk = pt * _round_up(nt, _SUBLANE) * _round_up(ct, _LANE) * ob
        v = 2 * (x_blk + w_blk + o_blk)                               # double-buffered
        v += pt * _round_up(nt, _SUBLANE) * _round_up(ct, _LANE) * 4  # f32 accumulator
        if norm:
            # normalized-weight scratch + transient f32 copy of the weight block
            v += pt * _round_up(c_in, _SUBLANE) * _round_up(ct, _LANE) * (wb + 4)
        return v

    # Shrink order: n first (traffic-neutral), then p (more steps, same bytes),
    # then co last (shrinking co re-streams x more often in weight-resident mode).
    while n_tile > _SUBLANE and est_vmem(p_tile, n_tile, co_tile) > vmem_budget_bytes:
        n_tile = max(_SUBLANE, _round_up(n_tile // 2, _SUBLANE))
    while p_tile > 1 and est_vmem(p_tile, n_tile, co_tile) > vmem_budget_bytes:
        p_tile = _cdiv(p_tile, 2)
    while co_tile > _LANE and est_vmem(p_tile, n_tile, co_tile) > vmem_budget_bytes:
        co_tile = max(_LANE, _round_up(co_tile // 2, _LANE))

    # Guarantee >= 2 grid steps so the "parallel" axes can shard across v7x's
    # two TensorCores (no effect on single-TC v5e/v6e).
    if _cdiv(p, p_tile) * _cdiv(n, n_tile) * _cdiv(c_out, co_tile) == 1:
        if p > 1:
            p_tile = _cdiv(p, 2)
        elif n > _SUBLANE:
            n_tile = _round_up(_cdiv(n, 2), _SUBLANE)
        elif c_out > _LANE:
            co_tile = _round_up(_cdiv(c_out, 2), _LANE)

    grid_p = _cdiv(p, p_tile)
    grid_n = _cdiv(n, n_tile)
    grid_co = _cdiv(c_out, co_tile)

    # ---- choose grid order so the operand that would otherwise be re-fetched
    # the most stays VMEM-resident across the innermost axis.
    x_bytes = p * n * c_in * xb
    w_bytes = p * c_in * c_out * wb
    o_bytes = p * n * c_out * ob
    traffic_w_res = w_bytes + x_bytes * grid_co + o_bytes   # grid (p, co, n)
    traffic_x_res = x_bytes + w_bytes * grid_n + o_bytes    # grid (p, n, co)
    weight_resident = traffic_w_res <= traffic_x_res

    if weight_resident:
        grid = (grid_p, grid_co, grid_n)
        x_spec = pl.BlockSpec((p_tile, n_tile, c_in), lambda pi, ci, ni: (pi, ni, 0))
        w_spec = pl.BlockSpec((p_tile, c_in, co_tile), lambda pi, ci, ni: (pi, 0, ci))
        o_spec = pl.BlockSpec((p_tile, n_tile, co_tile), lambda pi, ci, ni: (pi, ni, ci))
        bytes_accessed = traffic_w_res
        if norm:
            kernel = _kernel_norm_cached
            scratch_shapes = [pltpu.VMEM((p_tile, c_in, co_tile), fc_bin.dtype)]
            # Innermost n axis carries the scratch reuse -> keep it un-sharded.
            dim_sem = ("parallel", "parallel", "arbitrary")
            transcendentals = p * c_out
        else:
            kernel = _kernel_plain
            scratch_shapes = []
            dim_sem = ("parallel", "parallel", "parallel")
            transcendentals = 0
    else:
        grid = (grid_p, grid_n, grid_co)
        x_spec = pl.BlockSpec((p_tile, n_tile, c_in), lambda pi, ni, ci: (pi, ni, 0))
        w_spec = pl.BlockSpec((p_tile, c_in, co_tile), lambda pi, ni, ci: (pi, 0, ci))
        o_spec = pl.BlockSpec((p_tile, n_tile, co_tile), lambda pi, ni, ci: (pi, ni, ci))
        bytes_accessed = traffic_x_res
        kernel = _kernel_norm_inline if norm else _kernel_plain
        scratch_shapes = []
        dim_sem = ("parallel", "parallel", "parallel")
        transcendentals = p * c_out * grid_n if norm else 0

    # vmem_limit derived from the chosen tiles (+25% headroom), capped below
    # physical VMEM so it stays portable to v7x.
    est = est_vmem(p_tile, n_tile, co_tile)
    vmem_limit = int(min(int(vmem_cap * 0.9),
                         max(est * 5 // 4, 16 * 1024 * 1024)))

    return pl.pallas_call(
        kernel,
        out_shape=jax.ShapeDtypeStruct((p, n, c_out), out_dtype),
        grid=grid,
        in_specs=[x_spec, w_spec],
        out_specs=o_spec,
        scratch_shapes=scratch_shapes,
        compiler_params=pltpu.CompilerParams(
            dimension_semantics=dim_sem,
            vmem_limit_bytes=vmem_limit,
        ),
        cost_estimate=pl.CostEstimate(
            flops=2 * p * n * c_in * c_out,
            transcendentals=transcendentals,
            bytes_accessed=bytes_accessed,
        ),
    )(x, fc_bin)


def init_fc_bin(key, parts_num, in_channels, out_channels, dtype=jnp.float32):
    # Xavier-uniform matching nn.init.xavier_uniform_ on a (p, c_in, c_out)
    # tensor: fan_in = c_in * c_out, fan_out = p * c_out (PyTorch >2-D rule).
    fan_in = in_channels * out_channels
    fan_out = parts_num * out_channels
    bound = (6.0 / (fan_in + fan_out)) ** 0.5
    return jax.random.uniform(
        key, (parts_num, in_channels, out_channels), dtype=dtype,
        minval=-bound, maxval=bound)


if __name__ == "__main__":
    parts_num = 8
    n = 4            # batch
    in_channels = 32
    out_channels = 16

    key = jax.random.PRNGKey(0)
    k_x, k_w = jax.random.split(key)

    x = jax.random.normal(k_x, (parts_num, n, in_channels), dtype=jnp.float32)
    fc_bin = init_fc_bin(k_w, parts_num, in_channels, out_channels)

    # norm=False path
    out = jax.block_until_ready(separate_fcs(x, fc_bin, norm=False))
    ref = jnp.einsum("pnc,pco->pno", x, fc_bin)
    assert out.shape == (parts_num, n, out_channels)
    assert jnp.allclose(out, ref, atol=1e-5, rtol=1e-5)

    # norm=True path
    out_norm = jax.block_until_ready(separate_fcs(x, fc_bin, norm=True))
    w_n = fc_bin / jnp.maximum(
        jnp.linalg.norm(fc_bin, axis=1, keepdims=True), 1e-12)
    ref_norm = jnp.einsum("pnc,pco->pno", x, w_n)
    assert jnp.allclose(out_norm, ref_norm, atol=1e-5, rtol=1e-5)

    print("KERNEL_OK")
</pallas_src>

<mosaic_0001>
module attributes {stable_mosaic.version = 11 : i64} {
  func.func @_kernel_plain(%arg0: i32, %arg1: i32, %arg2: i32, %arg3: memref<4x4x32xf32, #tpu.memory_space<vmem>>, %arg4: memref<4x32x16xf32, #tpu.memory_space<vmem>>, %arg5: memref<4x4x16xf32, #tpu.memory_space<vmem>>) attributes {dimension_semantics = [#tpu.dimension_semantics<parallel>, #tpu.dimension_semantics<parallel>, #tpu.dimension_semantics<parallel>], iteration_bounds = array<i64: 2, 1, 1>, scalar_prefetch = 0 : i64, scratch_operands = 0 : i64, tpu.core_type = #tpu.core_type<tc>, window_params = [{transform_indices = @transform_0, window_bounds = array<i64: 4, 4, 32>}, {transform_indices = @transform_1, window_bounds = array<i64: 4, 32, 16>}, {transform_indices = @transform_2, window_bounds = array<i64: 4, 4, 16>}]} {
    %c0 = arith.constant 0 : index
    %c0_0 = arith.constant 0 : index
    %c0_1 = arith.constant 0 : index
    %0 = vector.load %arg3[%c0, %c0_0, %c0_1] : memref<4x4x32xf32, #tpu.memory_space<vmem>>, vector<4x4x32xf32>
    %c0_2 = arith.constant 0 : index
    %c0_3 = arith.constant 0 : index
    %c0_4 = arith.constant 0 : index
    %1 = vector.load %arg4[%c0_2, %c0_3, %c0_4] : memref<4x32x16xf32, #tpu.memory_space<vmem>>, vector<4x32x16xf32>
    "tpu.trace_start"() <{level = 10 : i32, message = "pnc,pco->pno"}> : () -> ()
    %cst = arith.constant dense<0.000000e+00> : vector<4x4x16xf32>
    %2 = tpu.matmul %0, %1, %cst {dimension_numbers = #tpu.dot_dimension_numbers<[2], [1], [1], [2], [0, 0, 0, 1, 1, 2], [0], [0]>} : vector<4x4x32xf32>, vector<4x32x16xf32>, vector<4x4x16xf32> -> vector<4x4x16xf32>
    "tpu.trace_stop"() : () -> ()
    %c0_5 = arith.constant 0 : index
    %c0_6 = arith.constant 0 : index
    %c0_7 = arith.constant 0 : index
    %3 = vector.load %arg5[%c0_5, %c0_6, %c0_7] : memref<4x4x16xf32, #tpu.memory_space<vmem>>, vector<4x4x16xf32>
    tpu.vector_store %arg5[%c0_5, %c0_6, %c0_7], %2 {strides = array<i32>} : memref<4x4x16xf32, #tpu.memory_space<vmem>>, vector<4x4x16xf32>,
    return
  }
  func.func @transform_0(%arg0: i32, %arg1: i32, %arg2: i32) -> (i32, i32, i32) {
    %c0_i32 = arith.constant 0 : i32
    %c0_i32_0 = arith.constant 0 : i32
    return %arg0, %arg2, %c0_i32 : i32, i32, i32
  }
  func.func @transform_1(%arg0: i32, %arg1: i32, %arg2: i32) -> (i32, i32, i32) {
    %c0_i32 = arith.constant 0 : i32
    %c0_i32_0 = arith.constant 0 : i32
    return %arg0, %c0_i32, %arg1 : i32, i32, i32
  }
  func.func @transform_2(%arg0: i32, %arg1: i32, %arg2: i32) -> (i32, i32, i32) {
    %c0_i32 = arith.constant 0 : i32
    return %arg0, %arg2, %arg1 : i32, i32, i32
  }
}

</mosaic_0001>

<bundles_post_ra>
// kernel: tpu_custom_call.1
= control target key start
LH: loop header
LB: loop body
LE: loop exit
PB: predicated region body
PF: predicated region fallthrough
CT: control target
= control target key end

     0   :  { %7 = vsyncpa [#allocation3], 0  ;;  %s1070_s0 = inlined_call_operand.vmem [shape: f32[8,4,32], index: 0, kind: input, shape index: {}]   ;;  %s1071_s1 = inlined_call_operand.vmem [shape: f32[8,32,16], index: 1, kind: input, shape index: {}]   ;;  %s1072_s2 = inlined_call_operand.hbm [shape: f32[8,4,16], index: 2, kind: output, shape index: {}]  }
   0x1   :  { %9 = vsyncpa [#allocation3 + $0x1], 0  ;;  %s917_s9 = smov 0   ;;  %s919_s10 = smov 0  }
   0x2   :  { %s921_s11 = smov 0   ;;  %s923_s12 = smov 0  }
   0x3   :  { %s925_s13 = smov 0   ;;  %s927_s14 = smov 0  }
   0x4 LB: > { %s646_s15 = sadd.s32 4294967295, %s894_s14   ;;  %s647_s16 = sadd.s32 4294967294, %s894_s14   ;;  %s894_s14 = sphi %s927_s14, %s15_s14   ;;  %s890_s13 = sphi %s925_s13, %s1079_s13   ;;  %s886_s12 = sphi %s923_s12, %s1078_s12   ;;  %s882_s11 = sphi %s921_s11, %s1077_s11   ;;  %s878_s10 = sphi %s919_s10, %s1076_s10   ;;  %s874_s9 = sphi %s917_s9, %s1075_s9  }
   0x5   : > { %s34_s17 = sadd.s32 1, %s890_s13  ;;  %s101_s18 = sadd.s32 1, %s882_s11 }
   0x6   : > { %p36_p0 = scmp.ge.s32.totalorder %s34_s17, 2  ;;  %p111_p1 = scmp.ne.s32.totalorder %s882_s11, %s878_s10 }
   0x7   : > { %p112_p2 = scmp.eq.s32.totalorder %s646_s15, 1  ;;  %p117_p3 = scmp.ne.s32.totalorder %s878_s10, %s874_s9 }
   0x8   : > { %s1081_s17 = smov (%p36_p0, %s34_s17), 0  ;;  %p118_p5 = scmp.eq.s32.totalorder %s647_s16, 1 }
   0x9   : > { %p957_p4 = por %p112_p2, %p111_p1  ;;  %s94_s20 = ssub.s32 %s890_s13, %s1081_s17 }
   0xa   : > { %p650_p6 = scmp.ge.s32.totalorder %s894_s14, 1  ;;  %p99_p7 = scmp.eq.s32.totalorder %s94_s20, 0 }
   0xb   : > { %p964_p8 = por %p118_p5, %p117_p3  ;;  %p161_p9 = scmp.lt.s32.totalorder %s894_s14, 3 }
   0xc   : > { %s970_s22 = scalar_select %p99_p7, %s882_s11, %s101_s18  }
   0xd   : > { %p162_p10 = pnand %p650_p6, %p161_p9 }
   0xe   : > { %s652_s23 = sshll.u32 (!%p162_p10), %s886_s12, 2  ;;  %v896_v0 = vmov (!%p162_p10), 0.0|0.0   ;;  %vm897_vm0 = vmmov (!%p162_p10), 0   ;;  %v898_v1 = vmov (!%p162_p10), 0.0   ;;  %vm235_vm1 = vcmask (!%p162_p10), 261120   ;;  %s192_s4 = sand.u32 (!%p162_p10), 1, %s878_s10  }
   0xf   : > { %165 = sbr.rel (%p162_p10) target bundleno = 271 (0x10f), region = 28  ;;  %732 = vmatprep.subr.bf16.mxu0 (!%p162_p10), %v896_v0  ;;  %738 = vmatprep.subr.bf16.mxu1 (!%p162_p10), %v896_v0  ;;  %p196_p11 = scmp.lt.s32.totalorder (!%p162_p10), %s652_s23, 7  ;;  %vm528_vm2 = vcmask (!%p162_p10), 125952  }
  0x10   : > { %696 = vmatprep.mubr.msk.f32.mxu0 (!%p162_p10), %vm897_vm0, %v898_v1  ;;  %707 = vmatprep.mubr.msk.f32.mxu1 (!%p162_p10), %vm897_vm0, %v898_v1  ;;  %s651_s5 = sshll.u32 (!%p162_p10), %s192_s4, 4  ;;  %s667_s8 = sshll.u32 (!%p162_p10), %s886_s12, 8 }
  0x11   : > { %s194_s6 = scalar_lea.vmem (!%p162_p10), [#allocation2], %s651_s5  ;;  %s1020_s18 = scalar_lea.hbm (!%p162_p10), %s1072_s2, %s667_s8 }
  0x12   : > { %s549_s7 = sshll.u32 (!%p162_p10), %s194_s6, 4  ;;  %s1024_s20 = scalar_lea.sflag (!%p162_p10), [#allocation3], %s192_s4  ;;  %s1015_s7 = int_to_ptr.vmem [resolvable:$true] %s549_s7 }
  0x13   : > { %s816_s12 = scalar_lea.vmem (!%p162_p10), %s1015_s7, 256 }
  0x14   : > { %p817_p12 = scmp.ne.s32.totalorder (!%p162_p10), %s1015_s7, %s816_s12 }
  0x16   : > { %s1083_s23 = smov (!%p196_p11, %s652_s23), 7  ;;  %p818_p13 = pnand %p817_p12, %p957_p4 }
  0x17   : > { %s666_s24 = sshll.u32 %s1083_s23, 5  ;;  %s653_s28 = sshll.u32 %s1083_s23, 2 }
  0x18   : > { %s978_s27 = scalar_lea.vmem %s1071_s1, %s666_s24  ;;  %s991_s3 = scalar_lea.vmem %s1070_s0, %s653_s28 }
  0x19   : > { %v219_v2 = vld [vmem:[%s978_s27] sm:$0xff]  ;;  %v220_v3 = vld [vmem:[%s978_s27 + $0x8] sm:$0xff]  ;;  %v221_v7 = vld [vmem:[%s978_s27 + $0x10] sm:$0xff]  ;;  %p819_p0 = pneg %p818_p13  ;;  %s899_s23 = smov [#allocation2]  }
  0x1a   : > { %v223_v4 = vld [vmem:[%s978_s27 + $0x20] sm:$0xff]  ;;  %v733_v5 = vpack.c.bf16 %v220_v3, %v219_v2  ;;  %v224_v6 = vld [vmem:[%s978_s27 + $0x28] sm:$0xff]  ;;  %v222_v8 = vld [vmem:[%s978_s27 + $0x18] sm:$0xff]  ;;  %s820_s24 = sshll.u32 %s899_s23, 4  ;;  %s821_s24 = int_to_ptr.vmem [resolvable:$false] %s820_s24 }
  0x1b   : > { %v739_v9 = vpack.c.bf16 %v224_v6, %v223_v4  ;;  %v225_v10 = vld [vmem:[%s978_s27 + $0x30] sm:$0xff]  ;;  %v226_v11 = vld [vmem:[%s978_s27 + $0x38] sm:$0xff]  ;;  %v736_v12 = vpack.c.bf16 %v222_v8, %v221_v7  ;;  %v227_v14 = vld [vmem:[%s978_s27 + $0x40] sm:$0xff]  ;;  %s822_s25 = scalar_lea.vmem %s821_s24, 512  ;;  %p823_p1 = scmp.lt.s32.totalorder %s1015_s7, %s821_s24 }
  0x1c   : > { %734 = vmatpush3.bf16.msra.mxu0 %v733_v5  ;;  %v742_v13 = vpack.c.bf16 %v226_v11, %v225_v10  ;;  %v228_v15 = vld [vmem:[%s978_s27 + $0x48] sm:$0xff]  ;;  %v231_v16 = vld [vmem:[%s978_s27 + $0x60] sm:$0xff]  ;;  %v229_v22 = vld [vmem:[%s978_s27 + $0x50] sm:$0xff]  ;;  %p824_p2 = scmp.lt.s32.totalorder %s822_s25, %s816_s12 }
  0x1d   : > { %740 = vmatpush3.bf16.msra.mxu1 %v739_v9  ;;  %735 = vmatprep.subr.bf16.mxu0 %v896_v0  ;;  %v232_v17 = vld [vmem:[%s978_s27 + $0x68] sm:$0xff]  ;;  %v215_v18 = vld [vmem:[%s991_s3] sm:$0xf]  ;;  %v745_v19 = vpack.c.bf16 %v228_v15, %v227_v14  ;;  %v216_v20 = vld [vmem:[%s991_s3 + $0x4] sm:$0xf] }
  0x1e   : > { %741 = vmatprep.subr.bf16.mxu1 %v896_v0  ;;  %v751_v21 = vpack.c.bf16 %v232_v17, %v231_v16  ;;  %v230_v23 = vld [vmem:[%s978_s27 + $0x58] sm:$0xff]  ;;  %v233_v24 = vld [vmem:[%s978_s27 + $0x70] sm:$0xff]  ;;  %v217_v28 = vld [vmem:[%s991_s3 + $0x8] sm:$0xf]  ;;  %p825_p3 = por %p824_p2, %p823_p1 }
  0x1f   : > { %v234_v25 = vld [vmem:[%s978_s27 + $0x78] sm:$0xff]  ;;  %v748_v26 = vpack.c.bf16 %v230_v23, %v229_v22  ;;  %v218_v29 = vld [vmem:[%s991_s3 + $0xc] sm:$0xf] }
  0x20   : > { %737 = vmatpush3.bf16.msra.mxu0 %v736_v12  ;;  %v754_v27 = vpack.c.bf16 %v234_v25, %v233_v24  ;;  %p826_p5 = pnand %p825_p3, %p819_p0 }
  0x21   : > { %743 = vmatpush3.bf16.msra.mxu1 %v742_v13  ;;  %744 = vmatprep.subr.bf16.mxu0 %v896_v0 }
  0x22   : > { %750 = vmatprep.subr.bf16.mxu1 %v896_v0 }
  0x23   : > { %697 = vmatmul.mubr.msk.f32.vlgmr.msra.gmra.mrb[0].mxu0 %vm235_vm1, %v215_v18 }
  0x24   : > { %708 = vmatmul.mubr.msk.f32.vlgmr.msra.gmra.mrb[0].mxu1 %vm235_vm1, %v216_v20  ;;  %746 = vmatpush3.bf16.msra.mxu0 %v745_v19 }
  0x25   : > { %752 = vmatpush3.bf16.msra.mxu1 %v751_v21  ;;  %747 = vmatprep.subr.bf16.mxu0 %v896_v0 }
  0x26   : > { %753 = vmatprep.subr.bf16.mxu1 %v896_v0  ;;  %718 = vmatprep.mubr.msk.f32.mxu0 %vm897_vm0, %v898_v1 }
  0x27   : > { %729 = vmatprep.mubr.msk.f32.mxu1 %vm897_vm0, %v898_v1 }
  0x28   : > { %749 = vmatpush3.bf16.msra.mxu0 %v748_v26 }
  0x29   : > { %755 = vmatpush3.bf16.msra.mxu1 %v754_v27 }
  0x2b   : > { %719 = vmatmul.mubr.msk.f32.vlgmr.msra.gmra.mrb[2].mxu0 %vm235_vm1, %v217_v28 }
  0x2c   : > { %730 = vmatmul.mubr.msk.f32.vlgmr.msra.gmra.mrb[2].mxu1 %vm235_vm1, %v218_v29 }
  0xf6   : > { %v305_v30 = vpop.f32.mrb[0].mxu0 }
  0xf7   : > { %529 = vst.msk [vmem:[%s194_s6] sm:$0xf] %vm528_vm2, %v305_v30  ;;  %v378_v31 = vpop.f32.mrb[0].mxu1  ;;  %v698_v32 = vpop.f32.mrb[1].mxu0 }
  0xf8   : > { %530 = vst.msk [vmem:[%s194_s6 + $0x4] sm:$0xf] %vm528_vm2, %v378_v31  ;;  %v709_v33 = vpop.f32.mrb[1].mxu1 }
  0xfe   : > { %v451_v34 = vpop.f32.mrb[2].mxu0 }
  0xff   : > { %531 = vst.msk [vmem:[%s194_s6 + $0x8] sm:$0xf] %vm528_vm2, %v451_v34  ;;  %v524_v35 = vpop.f32.mrb[2].mxu1  ;;  %v720_v36 = vpop.f32.mrb[3].mxu0 }
 0x100   : > { %532 = vst.msk [vmem:[%s194_s6 + $0xc] sm:$0xf] %vm528_vm2, %v524_v35  ;;  %v731_v37 = vpop.f32.mrb[3].mxu1 }
 0x101   : > { %829 = shalt.err (!%p826_p5)
}
 0x102   : > { %s830_s26 = scalar_lea.hbm %s1020_s18, 256  ;;  %s834_s29 = scalar_lea.hbm %s1072_s2, 512 }
 0x103   : > { %p831_p6 = scmp.ne.s32.totalorder %s1020_s18, %s830_s26  ;;  %p835_p10 = scmp.lt.u32.totalorder %s1020_s18, %s1072_s2 }
 0x104   : > { %p836_p11 = scmp.lt.u32.totalorder %s834_s29, %s830_s26  ;;  %p838_p13 = scmp.lt.u32.totalorder %s830_s26, %s1020_s18 }
 0x105   : > { %p832_p7 = pnand %p831_p6, %p957_p4 }
 0x106   : > { %p837_p12 = por %p836_p11, %p835_p10 }
 0x107   : > { %p833_p9 = pneg %p832_p7 }
 0x108   : > { %p839_p0 = por %p838_p13, %p837_p12 }
 0x10a   : > { %p840_p1 = pnand %p839_p0, %p833_p9 }
 0x10c   : > { %843 = shalt.err (!%p840_p1)
}
 0x10d   : > { %s900_s4 = smov 64   ;;  %s901_s5 = smov 4  }
 0x10e   : > { %756 = dma.vmem_to_hbm [thread:$0]  (%p957_p4), %s1015_s7, 256, %s1020_s18, %s1024_s20, %s900_s4, %s900_s4, %s901_s5  }
 0x10f PF: > { %p762_p2 = scmp.ge.s32.totalorder %s894_s14, 2  ;;  %s564_s6 = sand.u32 1, %s874_s9  }
 0x110   : > { %s565_s8 = scalar_lea.sflag [#allocation3], %s564_s6 }
 0x111   : > { %p759_p3 = pnand %p762_p2, %p964_p8 }
 0x113   : > { %869 = dma.done.wait (!%p759_p3), %s565_s8, 256  }
 0x114   : > { %871 = vsyncadd (!%p759_p3), %s565_s8, 4294967040  ;;  %s15_s14 = sadd.s32 1, %s894_s14   ;;  %s1075_s9 = smov %s878_s10 }
 0x115   : > { %p12_p5 = scmp.ge.s32.totalorder %s15_s14, 4   ;;  %s1076_s10 = smov %s882_s11 }
 0x116   : > { %s1077_s11 = smov %s970_s22  ;;  %s1078_s12 = smov %s890_s13 }
 0x117   : > { %s1079_s13 = smov %s1081_s17  ;;  %14 = sbr.rel (!%p12_p5) target bundleno = 4 (0x4), region = 66 }
 0x11e   :  { %570 = vsyncpa [#allocation3], 1 }
 0x11f   :  { %572 = vsyncpa [#allocation3 + $0x1], 1 }

</bundles_post_ra>
